<compile_context>
chip_gen: v7x
topology: tpu7x:2x2x1
jax: 0.10.0
libtpu: 0.0.40
codegen_flags: <defaults>
</compile_context>

<pallas_src>
import functools

import jax
import jax.numpy as jnp
from jax.experimental import pallas as pl
from jax.experimental.pallas import tpu as pltpu


def _round_up(x, m):
    return (x + m - 1) // m * m


# ----------------------------------------------------------------------------
# Pallas kernels: matmul with fused BN(+residual)(+ReLU) epilogue
# ----------------------------------------------------------------------------
def _mm_fused_kernel(a_ref, b_ref, s_ref, t_ref, o_ref, *, relu):
    acc = jnp.dot(a_ref[...], b_ref[...], preferred_element_type=jnp.float32)
    y = acc * s_ref[...] + t_ref[...]
    if relu:
        y = jnp.maximum(y, 0.0)
    o_ref[...] = y.astype(o_ref.dtype)


def _mm_fused_res_kernel(a_ref, b_ref, s_ref, t_ref, r_ref, o_ref, *, relu):
    acc = jnp.dot(a_ref[...], b_ref[...], preferred_element_type=jnp.float32)
    y = acc * s_ref[...] + t_ref[...] + r_ref[...]
    if relu:
        y = jnp.maximum(y, 0.0)
    o_ref[...] = y.astype(o_ref.dtype)


def _mm_fused_acc_kernel(a_ref, b_ref, s_ref, t_ref, o_ref, acc_ref, *, relu):
    @pl.when(pl.program_id(2) == 0)
    def _():
        acc_ref[...] = jnp.zeros_like(acc_ref)

    acc_ref[...] += jnp.dot(a_ref[...], b_ref[...],
                            preferred_element_type=jnp.float32)

    @pl.when(pl.program_id(2) == pl.num_programs(2) - 1)
    def _():
        y = acc_ref[...] * s_ref[...] + t_ref[...]
        if relu:
            y = jnp.maximum(y, 0.0)
        o_ref[...] = y.astype(o_ref.dtype)


def _mm_fused_acc_res_kernel(a_ref, b_ref, s_ref, t_ref, r_ref, o_ref, acc_ref,
                             *, relu):
    @pl.when(pl.program_id(2) == 0)
    def _():
        acc_ref[...] = jnp.zeros_like(acc_ref)

    acc_ref[...] += jnp.dot(a_ref[...], b_ref[...],
                            preferred_element_type=jnp.float32)

    @pl.when(pl.program_id(2) == pl.num_programs(2) - 1)
    def _():
        y = acc_ref[...] * s_ref[...] + t_ref[...] + r_ref[...]
        if relu:
            y = jnp.maximum(y, 0.0)
        o_ref[...] = y.astype(o_ref.dtype)


def fused_matmul(a, b, scale, shift, residual=None, relu=True,
                 out_dtype=jnp.float32):
    """out = act(scale * (a @ b) + shift [+ residual]).

    a: [M, K], b: [K, N] (cast to bf16 for the MXU), scale/shift: [N] f32,
    residual: optional [M, N] f32. Accumulation and epilogue in f32.
    """
    M, K = a.shape
    K2, N = b.shape
    assert K == K2

    a = a.astype(jnp.bfloat16)
    b = b.astype(jnp.bfloat16)

    # Shape-adaptive tiles: never pad tiny M up to 128/256.
    Np = _round_up(N, 128)
    Kp = _round_up(K, 128)
    tm = 256 if M >= 256 else _round_up(M, 16)
    Mp = _round_up(M, tm)
    tn = 256 if Np % 256 == 0 else 128
    tn = min(tn, Np)

    a_p = jnp.pad(a, ((0, Mp - M), (0, Kp - K)))
    b_p = jnp.pad(b, ((0, Kp - K), (0, Np - N)))
    s_p = jnp.pad(scale.astype(jnp.float32).reshape(1, N),
                  ((0, 0), (0, Np - N)))
    t_p = jnp.pad(shift.astype(jnp.float32).reshape(1, N),
                  ((0, 0), (0, Np - N)))
    if residual is not None:
        r_p = jnp.pad(residual.astype(jnp.float32),
                      ((0, Mp - M), (0, Np - N)))

    # Single K-step whenever the double-buffered bf16 operands + f32 out fit a
    # conservative VMEM budget (safe under v7x's 64 MiB / 32 MiB scoped).
    single_k_bytes = 2 * (tm * Kp + Kp * tn) * 2 + 2 * tm * tn * 4
    if single_k_bytes <= 12 * 1024 * 1024:
        grid = (Mp // tm, Np // tn)
        in_specs = [
            pl.BlockSpec((tm, Kp), lambda i, j: (i, 0)),
            pl.BlockSpec((Kp, tn), lambda i, j: (0, j)),
            pl.BlockSpec((1, tn), lambda i, j: (0, j)),
            pl.BlockSpec((1, tn), lambda i, j: (0, j)),
        ]
        args = [a_p, b_p, s_p, t_p]
        if residual is None:
            kern = functools.partial(_mm_fused_kernel, relu=relu)
        else:
            kern = functools.partial(_mm_fused_res_kernel, relu=relu)
            in_specs.append(pl.BlockSpec((tm, tn), lambda i, j: (i, j)))
            args.append(r_p)
        out = pl.pallas_call(
            kern,
            out_shape=jax.ShapeDtypeStruct((Mp, Np), out_dtype),
            grid_spec=pltpu.PrefetchScalarGridSpec(
                num_scalar_prefetch=0,
                grid=grid,
                in_specs=in_specs,
                out_specs=pl.BlockSpec((tm, tn), lambda i, j: (i, j)),
            ),
            compiler_params=pltpu.CompilerParams(
                dimension_semantics=("parallel", "parallel")),
        )(*args)
    else:
        # Fallback for very large K: classic K-last accumulator matmul with the
        # same fused epilogue on the final K step.
        if Kp % 512 == 0:
            tk = 512
        elif Kp % 256 == 0:
            tk = 256
        else:
            tk = 128
        grid = (Mp // tm, Np // tn, Kp // tk)
        in_specs = [
            pl.BlockSpec((tm, tk), lambda i, j, k: (i, k)),
            pl.BlockSpec((tk, tn), lambda i, j, k: (k, j)),
            pl.BlockSpec((1, tn), lambda i, j, k: (0, j)),
            pl.BlockSpec((1, tn), lambda i, j, k: (0, j)),
        ]
        args = [a_p, b_p, s_p, t_p]
        if residual is None:
            kern = functools.partial(_mm_fused_acc_kernel, relu=relu)
        else:
            kern = functools.partial(_mm_fused_acc_res_kernel, relu=relu)
            in_specs.append(pl.BlockSpec((tm, tn), lambda i, j, k: (i, j)))
            args.append(r_p)
        out = pl.pallas_call(
            kern,
            out_shape=jax.ShapeDtypeStruct((Mp, Np), out_dtype),
            grid_spec=pltpu.PrefetchScalarGridSpec(
                num_scalar_prefetch=0,
                grid=grid,
                in_specs=in_specs,
                out_specs=pl.BlockSpec((tm, tn), lambda i, j, k: (i, j)),
                scratch_shapes=[pltpu.VMEM((tm, tn), jnp.float32)],
            ),
            compiler_params=pltpu.CompilerParams(
                dimension_semantics=("parallel", "parallel", "arbitrary")),
        )(*args)

    if Mp != M or Np != N:
        out = out[:M, :N]
    return out


# ----------------------------------------------------------------------------
# Pallas kernel: 3x3 stride-2 maxpool as 9-tap elementwise max (lane-dense)
# ----------------------------------------------------------------------------
def _max9_kernel(t0, t1, t2, t3, t4, t5, t6, t7, t8, o_ref):
    m = jnp.maximum(t0[...], t1[...])
    m = jnp.maximum(m, t2[...])
    m = jnp.maximum(m, t3[...])
    m = jnp.maximum(m, t4[...])
    m = jnp.maximum(m, t5[...])
    m = jnp.maximum(m, t6[...])
    m = jnp.maximum(m, t7[...])
    m = jnp.maximum(m, t8[...])
    o_ref[...] = m


def maxpool_3x3_s2_p1(x):
    B, H, W, C = x.shape
    xp = jnp.pad(x, ((0, 0), (1, 1), (1, 1), (0, 0)),
                 constant_values=-jnp.inf)
    OH = (H + 2 - 3) // 2 + 1
    OW = (W + 2 - 3) // 2 + 1
    taps = [xp[:, i:i + 2 * OH:2, j:j + 2 * OW:2, :]
            for i in range(3) for j in range(3)]

    M = B * OH * OW
    total = M * C
    # Lane-dense 2D view (last dim 128) when possible; elementwise max is
    # position-wise so any consistent reshape is valid.
    if total % 1024 == 0:
        R, L = total // 128, 128
    else:
        R, L = M, C
    taps2 = [t.reshape(R, L) for t in taps]

    tr = R
    for cand in (1024, 512, 256, 128, 64, 32, 16, 8):
        if R % cand == 0:
            tr = cand
            break

    out = pl.pallas_call(
        _max9_kernel,
        out_shape=jax.ShapeDtypeStruct((R, L), x.dtype),
        grid_spec=pltpu.PrefetchScalarGridSpec(
            num_scalar_prefetch=0,
            grid=(R // tr,),
            in_specs=[pl.BlockSpec((tr, L), lambda i: (i, 0))
                      for _ in range(9)],
            out_specs=pl.BlockSpec((tr, L), lambda i: (i, 0)),
        ),
        compiler_params=pltpu.CompilerParams(
            dimension_semantics=("parallel",)),
    )(*taps2)
    return out.reshape(B, OH, OW, C)


# ----------------------------------------------------------------------------
# Conv wrapper: im2col glue (bf16) + fused Pallas matmul
# ----------------------------------------------------------------------------
def conv_bn_act(x, w, scale, shift, *, stride, padding, relu=True,
                residual=None):
    """x: [B, H, W, Cin] NHWC; w: [Cout, Cin, kh, kw] (PyTorch layout).

    Computes act(BN(conv(x)) [+ residual]) with BN folded into scale/shift
    inside the matmul epilogue. `residual` is a flattened [B*OH*OW, Cout] f32.
    """
    B, H, W, Cin = x.shape
    Cout, _, kh, kw = w.shape
    x_bf = x.astype(jnp.bfloat16)

    if kh == 1 and kw == 1 and padding == 0:
        if stride > 1:
            x_bf = x_bf[:, ::stride, ::stride, :]
        OH, OW = x_bf.shape[1], x_bf.shape[2]
        a = x_bf.reshape(B * OH * OW, Cin)
    else:
        xp = jnp.pad(x_bf, ((0, 0), (padding, padding),
                            (padding, padding), (0, 0)))
        OH = (H + 2 * padding - kh) // stride + 1
        OW = (W + 2 * padding - kw) // stride + 1
        cols = [xp[:, i:i + stride * OH:stride, j:j + stride * OW:stride, :]
                for i in range(kh) for j in range(kw)]
        a = jnp.concatenate(cols, axis=-1).reshape(B * OH * OW, kh * kw * Cin)
        # TODO(synk): full implicit-GEMM (tap index folded into the K grid axis
        # reading the padded NHWC activation directly from HBM) would remove
        # this bf16 im2col materialization entirely.

    wmat = jnp.transpose(w, (2, 3, 1, 0)).reshape(kh * kw * Cin, Cout)
    y = fused_matmul(a, wmat, scale, shift, residual=residual, relu=relu)
    return y.reshape(B, OH, OW, Cout)


# ----------------------------------------------------------------------------
# ResNet18 pieces
# ----------------------------------------------------------------------------
def basic_block(x, p, stride):
    Cout = p["conv1_w"].shape[0]

    if "down_w" in p:
        idn = conv_bn_act(x, p["down_w"], p["down_bn_scale"],
                          p["down_bn_shift"], stride=stride, padding=0,
                          relu=False)
    else:
        idn = x  # stride == 1 and Cin == Cout in this case

    out = conv_bn_act(x, p["conv1_w"], p["bn1_scale"], p["bn1_shift"],
                      stride=stride, padding=1, relu=True)
    out = conv_bn_act(out, p["conv2_w"], p["bn2_scale"], p["bn2_shift"],
                      stride=1, padding=1, relu=True,
                      residual=idn.reshape(-1, Cout))
    return out


def encoder_cnn_forward(images_nchw, params, enc_hidden=256):
    """images_nchw: [B, 3, H, W] -> features [B, H'/32 * W'/32, enc_hidden]."""
    x = jnp.transpose(images_nchw, (0, 2, 3, 1))          # NCHW -> NHWC

    # stem: 7x7/s2 conv + BN + ReLU (fused) + 3x3/s2 maxpool
    x = conv_bn_act(x, params["conv1_w"], params["bn1_scale"],
                    params["bn1_shift"], stride=2, padding=3, relu=True)
    x = maxpool_3x3_s2_p1(x)

    # residual stages
    for name, stride in (("layer1", 1), ("layer2", 2),
                         ("layer3", 2), ("layer4", 2)):
        x = basic_block(x, params[name][0], stride)
        x = basic_block(x, params[name][1], 1)

    # conv_reduce: 1x1 conv 512 -> enc_hidden with bias (matmul over positions,
    # bias fused into the epilogue shift)
    B, H, W, C = x.shape
    a = x.reshape(B * H * W, C)
    wmat = jnp.transpose(params["reduce_w"].reshape(enc_hidden, C))  # [512,enc]
    y = fused_matmul(a, wmat, jnp.ones((enc_hidden,), jnp.float32),
                     params["reduce_b"], relu=False)

    # permute(0,2,3,1).view(B, H*W, C) == NHWC flatten
    return y.reshape(B, H * W, enc_hidden)


# ----------------------------------------------------------------------------
# Deterministic synthetic parameters (shapes match torchvision resnet18)
# ----------------------------------------------------------------------------
def init_params(key, enc_hidden=256):
    keys = iter(jax.random.split(key, 256))

    def nk():
        return next(keys)

    def conv_w(cout, cin, k):
        fan = cin * k * k
        return (jax.random.normal(nk(), (cout, cin, k, k), jnp.float32)
                / jnp.sqrt(float(fan)))

    def bn(c):
        gamma = 1.0 + 0.1 * jax.random.normal(nk(), (c,), jnp.float32)
        beta = 0.1 * jax.random.normal(nk(), (c,), jnp.float32)
        mean = 0.05 * jax.random.normal(nk(), (c,), jnp.float32)
        var = 1.0 + 0.1 * jnp.abs(jax.random.normal(nk(), (c,), jnp.float32))
        scale = gamma / jnp.sqrt(var + 1e-5)
        shift = beta - mean * scale
        return scale, shift

    def block(cin, cout, stride):
        b = {}
        b["conv1_w"] = conv_w(cout, cin, 3)
        b["bn1_scale"], b["bn1_shift"] = bn(cout)
        b["conv2_w"] = conv_w(cout, cout, 3)
        b["bn2_scale"], b["bn2_shift"] = bn(cout)
        if stride != 1 or cin != cout:
            b["down_w"] = conv_w(cout, cin, 1)
            b["down_bn_scale"], b["down_bn_shift"] = bn(cout)
        return b

    p = {}
    p["conv1_w"] = conv_w(64, 3, 7)
    p["bn1_scale"], p["bn1_shift"] = bn(64)
    p["layer1"] = [block(64, 64, 1), block(64, 64, 1)]
    p["layer2"] = [block(64, 128, 2), block(128, 128, 1)]
    p["layer3"] = [block(128, 256, 2), block(256, 256, 1)]
    p["layer4"] = [block(256, 512, 2), block(512, 512, 1)]
    p["reduce_w"] = conv_w(enc_hidden, 512, 1)
    p["reduce_b"] = 0.1 * jax.random.normal(nk(), (enc_hidden,), jnp.float32)
    return p


# ----------------------------------------------------------------------------
if __name__ == "__main__":
    ENC_HIDDEN = 256
    key = jax.random.PRNGKey(0)
    pkey, xkey = jax.random.split(key)

    params = init_params(pkey, enc_hidden=ENC_HIDDEN)
    # small input consistent with the module: NCHW, 3 channels, 64x64
    # (ResNet18 downsamples by 32x -> 2x2 spatial -> seq len 4)
    images = jax.random.normal(xkey, (2, 3, 64, 64), jnp.float32)

    feats = encoder_cnn_forward(images, params, enc_hidden=ENC_HIDDEN)
    feats = jax.block_until_ready(feats)

    assert feats.shape == (2, 4, ENC_HIDDEN), feats.shape
    assert feats.dtype == jnp.float32
    print("KERNEL_OK")
</pallas_src>

<mosaic_0001>
module attributes {stable_mosaic.version = 11 : i64} {
  func.func @_mm_fused_kernel(%arg0: i32, %arg1: i32, %arg2: memref<256x256xbf16, #tpu.memory_space<vmem>>, %arg3: memref<256x128xbf16, #tpu.memory_space<vmem>>, %arg4: memref<1x128xf32, #tpu.memory_space<vmem>>, %arg5: memref<1x128xf32, #tpu.memory_space<vmem>>, %arg6: memref<256x128xf32, #tpu.memory_space<vmem>>) attributes {dimension_semantics = [#tpu.dimension_semantics<parallel>, #tpu.dimension_semantics<parallel>], iteration_bounds = array<i64: 8, 1>, scalar_prefetch = 0 : i64, scratch_operands = 0 : i64, tpu.core_type = #tpu.core_type<tc>, window_params = [{transform_indices = @transform_0, window_bounds = array<i64: 256, 256>}, {transform_indices = @transform_1, window_bounds = array<i64: 256, 128>}, {transform_indices = @transform_2, window_bounds = array<i64: 1, 128>}, {transform_indices = @transform_3, window_bounds = array<i64: 1, 128>}, {transform_indices = @transform_4, window_bounds = array<i64: 256, 128>}]} {
    %c0 = arith.constant 0 : index
    %c0_0 = arith.constant 0 : index
    %0 = vector.load %arg2[%c0, %c0_0] : memref<256x256xbf16, #tpu.memory_space<vmem>>, vector<256x256xbf16>
    %c0_1 = arith.constant 0 : index
    %c0_2 = arith.constant 0 : index
    %1 = vector.load %arg3[%c0_1, %c0_2] : memref<256x128xbf16, #tpu.memory_space<vmem>>, vector<256x128xbf16>
    %cst = arith.constant dense<0.000000e+00> : vector<256x128xf32>
    %2 = tpu.matmul %0, %1, %cst {dimension_numbers = #tpu.dot_dimension_numbers<[1], [0], [0], [1], [0, 0, 1, 1], [], []>} : vector<256x256xbf16>, vector<256x128xbf16>, vector<256x128xf32> -> vector<256x128xf32>
    %c0_3 = arith.constant 0 : index
    %c0_4 = arith.constant 0 : index
    %3 = vector.load %arg4[%c0_3, %c0_4] : memref<1x128xf32, #tpu.memory_space<vmem>>, vector<1x128xf32>
    %4 = vector.broadcast %3 : vector<1x128xf32> to vector<256x128xf32>
    %5 = arith.mulf %2, %4 : vector<256x128xf32>
    %c0_5 = arith.constant 0 : index
    %c0_6 = arith.constant 0 : index
    %6 = vector.load %arg5[%c0_5, %c0_6] : memref<1x128xf32, #tpu.memory_space<vmem>>, vector<1x128xf32>
    %7 = vector.broadcast %6 : vector<1x128xf32> to vector<256x128xf32>
    %8 = arith.addf %5, %7 : vector<256x128xf32>
    %cst_7 = arith.constant 0.000000e+00 : f32
    %9 = vector.broadcast %cst_7 : f32 to vector<256x128xf32>
    %10 = arith.maximumf %8, %9 : vector<256x128xf32>
    %c0_8 = arith.constant 0 : index
    %c0_9 = arith.constant 0 : index
    %11 = vector.load %arg6[%c0_8, %c0_9] : memref<256x128xf32, #tpu.memory_space<vmem>>, vector<256x128xf32>
    tpu.vector_store %arg6[%c0_8, %c0_9], %10 {strides = array<i32>} : memref<256x128xf32, #tpu.memory_space<vmem>>, vector<256x128xf32>,
    return
  }
  func.func @transform_0(%arg0: i32, %arg1: i32) -> (i32, i32) {
    %c0_i32 = arith.constant 0 : i32
    %c0_i32_0 = arith.constant 0 : i32
    return %arg0, %c0_i32 : i32, i32
  }
  func.func @transform_1(%arg0: i32, %arg1: i32) -> (i32, i32) {
    %c0_i32 = arith.constant 0 : i32
    %c0_i32_0 = arith.constant 0 : i32
    return %c0_i32, %arg1 : i32, i32
  }
  func.func @transform_2(%arg0: i32, %arg1: i32) -> (i32, i32) {
    %c0_i32 = arith.constant 0 : i32
    %c0_i32_0 = arith.constant 0 : i32
    return %c0_i32, %arg1 : i32, i32
  }
  func.func @transform_3(%arg0: i32, %arg1: i32) -> (i32, i32) {
    %c0_i32 = arith.constant 0 : i32
    %c0_i32_0 = arith.constant 0 : i32
    return %c0_i32, %arg1 : i32, i32
  }
  func.func @transform_4(%arg0: i32, %arg1: i32) -> (i32, i32) {
    %c0_i32 = arith.constant 0 : i32
    return %arg0, %arg1 : i32, i32
  }
}

</mosaic_0001>

<bundles_post_ra>
// kernel: tpu_custom_call.1
= control target key start
LH: loop header
LB: loop body
LE: loop exit
PB: predicated region body
PF: predicated region fallthrough
CT: control target
= control target key end

     0   :  { %9 = vsyncpa [#allocation3], 0  ;;  %s1929_s0 = inlined_call_operand.hbm [shape: bf16[2048,256], index: 0, kind: input, shape index: {}]   ;;  %s1930_s1 = inlined_call_operand.hbm [shape: bf16[256,128], index: 1, kind: input, shape index: {}]   ;;  %s1931_s2 = inlined_call_operand.vmem [shape: f32[1,128], index: 2, kind: input, shape index: {}]   ;;  %s1932_s3 = inlined_call_operand.vmem [shape: f32[1,128], index: 3, kind: input, shape index: {}]   ;;  %s1933_s4 = inlined_call_operand.hbm [shape: f32[2048,128], index: 4, kind: output, shape index: {}]  }
   0x1   :  { %11 = vsyncpa [#allocation3 + $0x1], 0 }
   0x2   :  { %12 = vsyncpa [#allocation6], 0 }
   0x3   :  { %13 = vsyncpa [#allocation4], 0 }
   0x4   :  { %15 = vsyncpa [#allocation4 + $0x1], 0  ;;  %s1565_s15 = smov 0   ;;  %s1567_s16 = smov 0  }
   0x5   :  { %s1569_s17 = smov 0   ;;  %s1571_s18 = smov 0  }
   0x6   :  { %s1573_s19 = smov 0   ;;  %s1575_s20 = smov 0  }
   0x7 LB: > { %s1041_s21 = sadd.s32 4294967295, %s1529_s20   ;;  %s1042_s22 = sadd.s32 4294967294, %s1529_s20   ;;  %s1529_s20 = sphi %s1575_s20, %s21_s20   ;;  %s1525_s19 = sphi %s1573_s19, %s1956_s19   ;;  %s1521_s18 = sphi %s1571_s18, %s1955_s18   ;;  %s1517_s17 = sphi %s1569_s17, %s1954_s17   ;;  %s1513_s16 = sphi %s1567_s16, %s1953_s16   ;;  %s1509_s15 = sphi %s1565_s15, %s1952_s15  }
   0x8   : > { %p53_p0 = scmp.ne.s32.totalorder %s1513_s16, %s1509_s15  ;;  %p1599_p1 = scmp.eq.s32.totalorder %s1041_s21, 0 }
   0x9   : > { %p1603_p2 = scmp.eq.s32.totalorder %s1041_s21, 7  ;;  %p163_p3 = scmp.eq.s32.totalorder %s1042_s22, 7 }
   0xa   : > { %s1938_s23 = scalar_select %p1599_p1, 1, 0 }
   0xb   : > { %s1939_s24 = scalar_select %p1603_p2, 1, 0 }
   0xc   : > { %p1609_p4 = por %p1599_p1, %p53_p0  ;;  %p1043_p5 = scmp.ge.s32.totalorder %s1529_s20, 1 }
   0xd   : > { %p1614_p6 = por %p163_p3, %p53_p0  ;;  %p170_p7 = scmp.lt.s32.totalorder %s1529_s20, 9 }
   0xe   : > { %s1940_s25 = scalar_select %p1609_p4, 1, 0 }
   0xf   : > { %s1941_s26 = scalar_select %p1614_p6, 1, 0 }
  0x10   : > { %p1619_p8 = pnand %p1043_p5, %p170_p7  ;;  %s1531_s28 = smov [#allocation5]  }
  0x11   : > { %s184_s29 = sshll.u32 %s1531_s28, 4  ;;  %s33_s5 = sadd.s32 1, %s1525_s19  ;;  %s185_s29 = int_to_ptr.vmem [resolvable:$true] %s184_s29 }
  0x12   : > { %s1942_s27 = scalar_select %p1619_p8, 1, 0 }
  0x13   : > { %p1250_p9 = pneg %p1619_p8  ;;  %s1385_s8 = scalar_lea.hbm %s1930_s1, 2048 }
  0x14   : > { %p1386_p11 = scmp.ne.s32.totalorder %s1930_s1, %s1385_s8  ;;  %p1392_p3 = scmp.lt.u32.totalorder %s1385_s8, %s1930_s1 }
  0x15   : > { %p1627_p10 = pnand %p1250_p9, %p1599_p1 }
  0x17   : > { %p1387_p12 = pneg %p1627_p10 }
  0x19   : > { %p1388_p13 = pnand %p1387_p12, %p1386_p11 }
  0x1b   : > { %p1389_p0 = pneg %p1388_p13 }
  0x1d   : > { %p1394_p5 = pnand %p1392_p3, %p1389_p0 }
  0x1f   : > { %1397 = shalt.err (!%p1394_p5)
}
  0x20   : > { %s1398_s13 = scalar_lea.vmem %s185_s29, 2048  ;;  %p1406_p1 = scmp.lt.s32.totalorder %s185_s29, %s185_s29 }
  0x21   : > { %p1399_p7 = scmp.ne.s32.totalorder %s185_s29, %s1398_s13  ;;  %p1407_p4 = scmp.lt.s32.totalorder %s1398_s13, %s1398_s13 }
  0x23   : > { %p1401_p9 = pnand %p1399_p7, %p1387_p12  ;;  %p1408_p8 = por %p1407_p4, %p1406_p1 }
  0x25   : > { %p1402_p6 = pneg %p1401_p9 }
  0x27   : > { %p1409_p2 = pnand %p1408_p8, %p1402_p6 }
  0x29   : > { %1412 = shalt.err (!%p1409_p2)
}
  0x2a   : > { %s1532_s14 = smov 64   ;;  %s1533_s21 = smov 4  }
  0x2b   : > { %1253 = dma.hbm_to_vmem [thread:$0]  (!%p1627_p10), %s1930_s1, 2048, %s185_s29, [#allocation6], %s1532_s14, %s1532_s14, %s1533_s21  }
  0x2c   : > { %p35_p1 = scmp.ge.s32.totalorder %s33_s5, 8  ;;  %s40_s6 = sadd.s32 1, %s1517_s17 }
  0x2d   : > { %p47_p2 = scmp.ne.s32.totalorder %s1517_s17, %s1513_s16  ;;  %p48_p4 = scmp.eq.s32.totalorder %s1529_s20, 0 }
  0x2e   : > { %s1958_s5 = smov (%p35_p1, %s33_s5), 0  ;;  %p1945_p8 = scmp.ne.s32.totalorder %s1939_s24, 0 }
  0x2f   : > { %p1654_p6 = por %p48_p4, %p47_p2  ;;  %s37_s30 = ssub.s32 %s1525_s19, %s1958_s5 }
  0x30   : > { %p1660_p11 = por %p1945_p8, %p47_p2  ;;  %p1263_p12 = scmp.lt.s32.totalorder %s1529_s20, 8 }
  0x31   : > { %p38_p10 = scmp.eq.s32.totalorder %s37_s30, 0  ;;  %s210_s29 = sand.u32 1, %s1517_s17  }
  0x32   : > { %s1048_s9 = sshll.u32 %s210_s29, 8  ;;  %s1112_s11 = sshll.u32 %s1525_s19, 12 }
  0x33   : > { %s1669_s10 = scalar_select %p38_p10, %s1517_s17, %s40_s6  }
  0x34   : > { %s1675_s14 = scalar_lea.hbm %s1929_s0, %s1112_s11  ;;  %s214_s24 = scalar_lea.vmem [#allocation2], %s1048_s9 }
  0x35   : > { %s222_s21 = sshll.u32 %s214_s24, 4  ;;  %p1681_p13 = pnand %p1263_p12, %p1654_p6  ;;  %s1677_s21 = int_to_ptr.vmem [resolvable:$true] %s222_s21 }
  0x36   : > { %s1685_s28 = scalar_lea.sflag [#allocation3], %s210_s29  ;;  %s1413_s6 = scalar_lea.hbm %s1675_s14, 4096 }
  0x37   : > { %p1414_p0 = scmp.ne.s32.totalorder %s1675_s14, %s1413_s6  ;;  %p1415_p3 = pneg %p1681_p13 }
  0x38   : > { %s1418_s7 = scalar_lea.hbm %s1929_s0, 32768  ;;  %p1419_p9 = scmp.lt.u32.totalorder %s1675_s14, %s1929_s0 }
  0x39   : > { %p1416_p5 = pnand %p1415_p3, %p1414_p0  ;;  %p1420_p1 = scmp.lt.u32.totalorder %s1418_s7, %s1413_s6 }
  0x3a   : > { %p1422_p4 = scmp.lt.u32.totalorder %s1413_s6, %s1675_s14 }
  0x3b   : > { %p1417_p7 = pneg %p1416_p5  ;;  %p1421_p2 = por %p1420_p1, %p1419_p9 }
  0x3d   : > { %p1423_p6 = por %p1422_p4, %p1421_p2 }
  0x3f   : > { %p1424_p8 = pnand %p1423_p6, %p1417_p7 }
  0x41   : > { %1427 = shalt.err (!%p1424_p8)
}
  0x42   : > { %s1428_s29 = scalar_lea.vmem %s1677_s21, 4096  ;;  %s1534_s13 = smov [#allocation2]  }
  0x43   : > { %p1429_p12 = scmp.ne.s32.totalorder %s1677_s21, %s1428_s29  ;;  %s1433_s24 = sshll.u32 %s1534_s13, 4  ;;  %s1434_s24 = int_to_ptr.vmem [resolvable:$false] %s1433_s24 }
  0x44   : > { %s1435_s30 = scalar_lea.vmem %s1434_s24, 8192  ;;  %p1436_p5 = scmp.lt.s32.totalorder %s1677_s21, %s1434_s24 }
  0x45   : > { %p1431_p10 = pnand %p1429_p12, %p1415_p3  ;;  %p1437_p9 = scmp.lt.s32.totalorder %s1435_s30, %s1428_s29 }
  0x47   : > { %p1432_p0 = pneg %p1431_p10  ;;  %p1438_p1 = por %p1437_p9, %p1436_p5 }
  0x49   : > { %p1439_p2 = pnand %p1438_p1, %p1432_p0 }
  0x4b   : > { %1442 = shalt.err (!%p1439_p2)
}
  0x4c   : > { %s1535_s6 = smov 128   ;;  %s1536_s9 = smov 8  }
  0x4d   : > { %1257 = dma.hbm_to_vmem [thread:$0]  (!%p1681_p13), %s1675_s14, 4096, %s1677_s21, %s1685_s28, %s1535_s6, %s1535_s6, %s1536_s9  }
  0x4e   : > { %p1948_p3 = scmp.ne.s32.totalorder %s1942_s27, 0 }
  0x4f   : > { %s1716_s7 = sand.u32 (!%p1948_p3), 1, %s1513_s16   ;;  %p1949_p7 = scmp.ne.s32.totalorder (!%p1948_p3), %s1940_s25, 0 }
  0x50   : > { %234 = sbr.rel (%p1948_p3) target bundleno = 419 (0x1a3), region = 36  ;;  %s1053_s11 = sshll.u32 (!%p1948_p3), %s1716_s7, 8 }
  0x51   : > { %s237_s12 = scalar_lea.sflag (!%p1948_p3), [#allocation3], %s1716_s7  ;;  %s1722_s29 = scalar_lea.vmem (!%p1948_p3), [#allocation2], %s1053_s11 }
  0x57   : > { %1496 = dma.done.wait (%p1949_p7), %s237_s12, 4096  }
  0x58   : > { %1498 = vsyncadd (%p1949_p7), %s237_s12, 4294963200  ;;  %p1950_p13 = scmp.ne.s32.totalorder %s1938_s23, 0 }
  0x5a   : > { %1500 = dma.done.wait (%p1950_p13), [#allocation6], 2048  }
  0x5b   : > { %1502 = vsyncadd (%p1950_p13), [#allocation6], 4294965248  ;;  %v1321_v0 = vld [vmem:[#allocation5 + $0x40] sm:$0xff]   ;;  %v1323_v2 = vld [vmem:[#allocation5 + $0x48] sm:$0xff]   ;;  %s1784_s21 = scalar_lea.vmem [#allocation7], %s1053_s11  ;;  %s1113_s22 = sshll.u32 %s1521_s18, 12 }
  0x5c   : > { %v1322_v1 = vld [vmem:[#allocation5] sm:$0xff]   ;;  %1114 = vmatprep.subr.bf16.mxu0 %v1321_v0  ;;  %1226 = vmatprep.subr.bf16.mxu1 %v1321_v0  ;;  %v1324_v3 = vld [vmem:[#allocation5 + $0x8] sm:$0xff]   ;;  %v1325_v4 = vld [vmem:[#allocation5 + $0x50] sm:$0xff]   ;;  %s922_s28 = sshll.u32 %s1784_s21, 4  ;;  %s1875_s30 = scalar_lea.hbm %s1933_s4, %s1113_s22  ;;  %s1877_s28 = int_to_ptr.vmem [resolvable:$true] %s922_s28 }
  0x5d   : > { %1115 = vmatpush3.bf16.msra.mxu0 %v1322_v1  ;;  %1234 = vmatpush3.bf16.msra.mxu1 %v1322_v1  ;;  %v1326_v5 = vld [vmem:[#allocation5 + $0x10] sm:$0xff]   ;;  %v1327_v6 = vld [vmem:[#allocation5 + $0x58] sm:$0xff]   ;;  %v1329_v8 = vld [vmem:[#allocation5 + $0x60] sm:$0xff]   ;;  %s908_s18 = scalar_lea.sflag [#allocation4], %s1716_s7  ;;  %s1443_s6 = scalar_lea.vmem %s1877_s28, 4096 }
  0x5e   : > { %1116 = vmatprep.subr.bf16.mxu0 %v1323_v2  ;;  %1227 = vmatprep.subr.bf16.mxu1 %v1323_v2  ;;  %v1328_v7 = vld [vmem:[#allocation5 + $0x18] sm:$0xff]   ;;  %v1330_v9 = vld [vmem:[#allocation5 + $0x20] sm:$0xff]   ;;  %v1331_v10 = vld [vmem:[#allocation5 + $0x68] sm:$0xff]   ;;  %p1444_p4 = scmp.ne.s32.totalorder %s1877_s28, %s1443_s6  ;;  %s1537_s9 = smov [#allocation7]  }
  0x5f   : > { %v1339_v11 = vld [vmem:[%s1722_s29 + $0x4] ss:$8 sps:$4 sm:$0xff]   ;;  %v1333_v14 = vld [vmem:[#allocation5 + $0x70] sm:$0xff]   ;;  %v1335_v16 = vld [vmem:[#allocation5 + $0x78] sm:$0xff]   ;;  %s1447_s11 = sshll.u32 %s1537_s9, 4  ;;  %s1448_s11 = int_to_ptr.vmem [resolvable:$false] %s1447_s11 }
  0x60   : > { %v1342_v12 = vld [vmem:[%s1722_s29 + $0x84] ss:$8 sps:$4 sm:$0xff]   ;;  %636 = vmatprep.mubr.bf16.mxu0 %v1339_v11  ;;  %v1334_v15 = vld [vmem:[#allocation5 + $0x30] sm:$0xff]   ;;  %v1336_v17 = vld [vmem:[#allocation5 + $0x38] sm:$0xff]   ;;  %p1445_p6 = pnand %p1444_p4, %p1660_p11  ;;  %s1449_s12 = scalar_lea.vmem %s1448_s11, 8192 }
  0x61   : > { %1117 = vmatpush3.bf16.msra.mxu0 %v1324_v3  ;;  %1235 = vmatpush3.bf16.msra.mxu1 %v1324_v3  ;;  %v1332_v13 = vld [vmem:[#allocation5 + $0x28] sm:$0xff]   ;;  %v1343_v20 = vld [vmem:[%s1722_s29 + $0x14] ss:$8 sps:$4 sm:$0xff]   ;;  %v1347_v22 = vld [vmem:[%s1722_s29 + $0x10] ss:$8 sps:$4 sm:$0xff]   ;;  %p1450_p12 = scmp.lt.s32.totalorder %s1877_s28, %s1448_s11  ;;  %p1451_p10 = scmp.lt.s32.totalorder %s1449_s12, %s1443_s6 }
  0x62   : > { %1118 = vmatprep.subr.bf16.mxu0 %v1325_v4  ;;  %1228 = vmatprep.subr.bf16.mxu1 %v1325_v4  ;;  %v1337_v18 = vld [vmem:[%s1722_s29] ss:$8 sps:$4 sm:$0xff]   ;;  %v1345_v21 = vld [vmem:[%s1722_s29 + $0x94] ss:$8 sps:$4 sm:$0xff]   ;;  %v1348_v23 = vld [vmem:[%s1722_s29 + $0x90] ss:$8 sps:$4 sm:$0xff]   ;;  %p1446_p8 = pneg %p1445_p6 }
  0x63   : > { %700 = vmatprep.mubr.bf16.mxu1 %v1342_v12  ;;  %v1340_v19 = vld [vmem:[%s1722_s29 + $0x80] ss:$8 sps:$4 sm:$0xff]   ;;  %v1349_v24 = vld [vmem:[%s1722_s29 + $0x24] ss:$8 sps:$4 sm:$0xff]   ;;  %v1355_v28 = vld [vmem:[%s1722_s29 + $0x34] ss:$8 sps:$4 sm:$0xff]   ;;  %p1452_p0 = por %p1451_p10, %p1450_p12 }
  0x64   : > { %v1351_v25 = vld [vmem:[%s1722_s29 + $0xa4] ss:$8 sps:$4 sm:$0xff]   ;;  %v1353_v26 = vld [vmem:[%s1722_s29 + $0x20] ss:$8 sps:$4 sm:$0xff]   ;;  %v1357_v29 = vld [vmem:[%s1722_s29 + $0xb4] ss:$8 sps:$4 sm:$0xff]  }
  0x65   : > { %1119 = vmatpush3.bf16.msra.mxu0 %v1326_v5  ;;  %1236 = vmatpush3.bf16.msra.mxu1 %v1326_v5  ;;  %v1354_v27 = vld [vmem:[%s1722_s29 + $0xa0] ss:$8 sps:$4 sm:$0xff]   ;;  %v1359_v30 = vld [vmem:[%s1722_s29 + $0x30] ss:$8 sps:$4 sm:$0xff]   ;;  %v1361_v32 = vld [vmem:[%s1722_s29 + $0x44] ss:$8 sps:$4 sm:$0xff]   ;;  %p1453_p5 = pnand %p1452_p0, %p1446_p8 }
  0x66   : > { %1120 = vmatprep.subr.bf16.mxu0 %v1327_v6  ;;  %1229 = vmatprep.subr.bf16.mxu1 %v1327_v6  ;;  %v1360_v31 = vld [vmem:[%s1722_s29 + $0xb0] ss:$8 sps:$4 sm:$0xff]   ;;  %v1363_v33 = vld [vmem:[%s1722_s29 + $0xc4] ss:$8 sps:$4 sm:$0xff]   ;;  %v1365_v34 = vld [vmem:[%s1722_s29 + $0x40] ss:$8 sps:$4 sm:$0xff]  }
  0x67   : > { %v1366_v35 = vld [vmem:[%s1722_s29 + $0xc0] ss:$8 sps:$4 sm:$0xff]   ;;  %v1367_v36 = vld [vmem:[%s1722_s29 + $0x54] ss:$8 sps:$4 sm:$0xff]   ;;  %v1371_v38 = vld [vmem:[%s1722_s29 + $0x50] ss:$8 sps:$4 sm:$0xff]  }
  0x68   : > { %v1369_v37 = vld [vmem:[%s1722_s29 + $0xd4] ss:$8 sps:$4 sm:$0xff]   ;;  %v1372_v39 = vld [vmem:[%s1722_s29 + $0xd0] ss:$8 sps:$4 sm:$0xff]   ;;  %v1373_v40 = vld [vmem:[%s1722_s29 + $0x64] ss:$8 sps:$4 sm:$0xff]  }
  0x69   : > { %1121 = vmatpush3.bf16.msra.mxu0 %v1328_v7  ;;  %1237 = vmatpush3.bf16.msra.mxu1 %v1328_v7  ;;  %v1375_v41 = vld [vmem:[%s1722_s29 + $0xe4] ss:$8 sps:$4 sm:$0xff]   ;;  %v1377_v42 = vld [vmem:[%s1722_s29 + $0x60] ss:$8 sps:$4 sm:$0xff]   ;;  %v1379_v44 = vld [vmem:[%s1722_s29 + $0x74] ss:$8 sps:$4 sm:$0xff]  }
  0x6a   : > { %1122 = vmatprep.subr.bf16.mxu0 %v1329_v8  ;;  %1230 = vmatprep.subr.bf16.mxu1 %v1329_v8  ;;  %v1378_v43 = vld [vmem:[%s1722_s29 + $0xe0] ss:$8 sps:$4 sm:$0xff]   ;;  %v1381_v45 = vld [vmem:[%s1722_s29 + $0xf4] ss:$8 sps:$4 sm:$0xff]   ;;  %v1383_v46 = vld [vmem:[%s1722_s29 + $0x70] ss:$8 sps:$4 sm:$0xff]  }
  0x6b   : > { %v1384_v47 = vld [vmem:[%s1722_s29 + $0xf0] ss:$8 sps:$4 sm:$0xff]   ;;  %v1767_v51 = vld [vmem:[%s1931_s2] ss:$0 sm:$0xff] }
  0x6c   : > { %v1772_v57 = vld [vmem:[%s1932_s3] ss:$0 sm:$0xff] }
  0x6d   : > { %1123 = vmatpush3.bf16.msra.mxu0 %v1330_v9  ;;  %1238 = vmatpush3.bf16.msra.mxu1 %v1330_v9 }
  0x6e   : > { %1124 = vmatprep.subr.bf16.mxu0 %v1331_v10  ;;  %1231 = vmatprep.subr.bf16.mxu1 %v1331_v10 }
  0x71   : > { %1125 = vmatpush3.bf16.msra.mxu0 %v1332_v13  ;;  %1239 = vmatpush3.bf16.msra.mxu1 %v1332_v13 }
  0x72   : > { %1126 = vmatprep.subr.bf16.mxu0 %v1333_v14  ;;  %1232 = vmatprep.subr.bf16.mxu1 %v1333_v14 }
  0x75   : > { %1127 = vmatpush3.bf16.msra.mxu0 %v1334_v15  ;;  %1240 = vmatpush3.bf16.msra.mxu1 %v1334_v15 }
  0x76   : > { %1128 = vmatprep.subr.bf16.mxu0 %v1335_v16  ;;  %1233 = vmatprep.subr.bf16.mxu1 %v1335_v16 }
  0x79   : > { %1129 = vmatpush3.bf16.msra.mxu0 %v1336_v17  ;;  %1241 = vmatpush3.bf16.msra.mxu1 %v1336_v17 }
  0x7c   : > { %637 = vmatmul.mubr.bf16.vlgmr.msra.gmra.mrb[0].mxu0 %v1337_v18  ;;  %701 = vmatmul.mubr.bf16.vlgmr.msra.gmra.mrb[0].mxu1 %v1340_v19 }
  0x7d   : > { %644 = vmatprep.mubr.bf16.mxu0 %v1343_v20  ;;  %708 = vmatprep.mubr.bf16.mxu1 %v1345_v21 }
  0x84   : > { %645 = vmatmul.mubr.bf16.gmra.mrb[4].mxu0 %v1347_v22  ;;  %709 = vmatmul.mubr.bf16.gmra.mrb[4].mxu1 %v1348_v23 }
  0x85   : > { %652 = vmatprep.mubr.bf16.mxu0 %v1349_v24  ;;  %716 = vmatprep.mubr.bf16.mxu1 %v1351_v25 }
  0x8c   : > { %653 = vmatmul.mubr.bf16.gmra.mrb[8].mxu0 %v1353_v26  ;;  %717 = vmatmul.mubr.bf16.gmra.mrb[8].mxu1 %v1354_v27 }
  0x8d   : > { %660 = vmatprep.mubr.bf16.mxu0 %v1355_v28  ;;  %724 = vmatprep.mubr.bf16.mxu1 %v1357_v29 }
  0x94   : > { %661 = vmatmul.mubr.bf16.gmra.mrb[12].mxu0 %v1359_v30  ;;  %725 = vmatmul.mubr.bf16.gmra.mrb[12].mxu1 %v1360_v31 }
  0x95   : > { %668 = vmatprep.mubr.bf16.mxu0 %v1361_v32  ;;  %732 = vmatprep.mubr.bf16.mxu1 %v1363_v33 }
  0x9c   : > { %669 = vmatmul.mubr.bf16.gmra.mrb[16].mxu0 %v1365_v34  ;;  %733 = vmatmul.mubr.bf16.gmra.mrb[16].mxu1 %v1366_v35 }
  0x9d   : > { %676 = vmatprep.mubr.bf16.mxu0 %v1367_v36  ;;  %740 = vmatprep.mubr.bf16.mxu1 %v1369_v37 }
  0xa4   : > { %677 = vmatmul.mubr.bf16.gmra.mrb[20].mxu0 %v1371_v38  ;;  %741 = vmatmul.mubr.bf16.gmra.mrb[20].mxu1 %v1372_v39 }
  0xa5   : > { %684 = vmatprep.mubr.bf16.mxu0 %v1373_v40  ;;  %748 = vmatprep.mubr.bf16.mxu1 %v1375_v41 }
  0xac   : > { %685 = vmatmul.mubr.bf16.gmra.mrb[24].mxu0 %v1377_v42  ;;  %749 = vmatmul.mubr.bf16.gmra.mrb[24].mxu1 %v1378_v43 }
  0xad   : > { %692 = vmatprep.mubr.bf16.mxu0 %v1379_v44  ;;  %756 = vmatprep.mubr.bf16.mxu1 %v1381_v45 }
  0xb4   : > { %693 = vmatmul.mubr.bf16.gmra.mrb[28].mxu0 %v1383_v46  ;;  %757 = vmatmul.mubr.bf16.gmra.mrb[28].mxu1 %v1384_v47 }
 0x14f   : > { %v1130_v48 = vpop.f32.mrb[0].mxu0  ;;  %v1178_v49 = vpop.f32.mrb[0].mxu1 }
 0x150   : > { %v1131_v50 = vpop.f32.mrb[1].mxu0  ;;  %v1179_v52 = vpop.f32.mrb[1].mxu1 }
 0x151   : > { %v1132_v53 = vadd.f32 %v1131_v50, %v1130_v48  ;;  %v1180_v54 = vadd.f32 %v1179_v52, %v1178_v49  ;;  %v1133_v55 = vpop.f32.mrb[2].mxu0  ;;  %v1181_v56 = vpop.f32.mrb[2].mxu1 }
 0x152   : > { %v1134_v58 = vpop.f32.mrb[3].mxu0  ;;  %v1182_v59 = vpop.f32.mrb[3].mxu1 }
 0x153   : > { %v772_v60 = vmul.f32 %v1132_v53, %v1767_v51  ;;  %v788_v61 = vmul.f32 %v1180_v54, %v1767_v51  ;;  %v1135_v62 = vadd.f32 %v1134_v58, %v1133_v55  ;;  %v1183_v63 = vadd.f32 %v1182_v59, %v1181_v56 }
 0x155   : > { %v811_v0 = vadd.f32 %v1772_v57, %v772_v60  ;;  %v827_v1 = vadd.f32 %v1772_v57, %v788_v61  ;;  %v773_v2 = vmul.f32 %v1135_v62, %v1767_v51  ;;  %v789_v3 = vmul.f32 %v1183_v63, %v1767_v51 }
 0x157   : > { %v843_v4 = vmax.f32 %v811_v0, 0.0  ;;  %v859_v5 = vmax.f32 %v827_v1, 0.0  ;;  %v812_v6 = vadd.f32 %v1772_v57, %v773_v2  ;;  %v828_v7 = vadd.f32 %v1772_v57, %v789_v3  ;;  %v1136_v8 = vpop.f32.mrb[4].mxu0  ;;  %v1184_v9 = vpop.f32.mrb[4].mxu1 }
 0x158   : > { %v1137_v10 = vpop.f32.mrb[5].mxu0  ;;  %v1185_v11 = vpop.f32.mrb[5].mxu1 }
 0x159   : > { %875 = vst [vmem:[%s1784_s21] sm:$0xff] %v843_v4  ;;  %891 = vst [vmem:[%s1784_s21 + $0x80] sm:$0xff] %v859_v5  ;;  %v844_v12 = vmax.f32 %v812_v6, 0.0  ;;  %v860_v13 = vmax.f32 %v828_v7, 0.0  ;;  %v1138_v14 = vadd.f32 %v1137_v10, %v1136_v8  ;;  %v1186_v15 = vadd.f32 %v1185_v11, %v1184_v9  ;;  %v1139_v16 = vpop.f32.mrb[6].mxu0  ;;  %v1187_v17 = vpop.f32.mrb[6].mxu1 }
 0x15a   : > { %v1140_v18 = vpop.f32.mrb[7].mxu0  ;;  %v1188_v19 = vpop.f32.mrb[7].mxu1 }
 0x15b   : > { %876 = vst [vmem:[%s1784_s21 + $0x8] sm:$0xff] %v844_v12  ;;  %892 = vst [vmem:[%s1784_s21 + $0x88] sm:$0xff] %v860_v13  ;;  %v774_v20 = vmul.f32 %v1138_v14, %v1767_v51  ;;  %v790_v21 = vmul.f32 %v1186_v15, %v1767_v51  ;;  %v1141_v22 = vadd.f32 %v1140_v18, %v1139_v16 }
 0x15c   : > { %v1189_v23 = vadd.f32 %v1188_v19, %v1187_v17 }
 0x15d   : > { %v813_v24 = vadd.f32 %v1772_v57, %v774_v20  ;;  %v829_v25 = vadd.f32 %v1772_v57, %v790_v21  ;;  %v775_v26 = vmul.f32 %v1141_v22, %v1767_v51 }
 0x15e   : > { %v791_v27 = vmul.f32 %v1189_v23, %v1767_v51 }
 0x15f   : > { %v845_v28 = vmax.f32 %v813_v24, 0.0  ;;  %v861_v29 = vmax.f32 %v829_v25, 0.0  ;;  %v814_v30 = vadd.f32 %v1772_v57, %v775_v26  ;;  %v1142_v32 = vpop.f32.mrb[8].mxu0  ;;  %v1190_v33 = vpop.f32.mrb[8].mxu1 }
 0x160   : > { %v830_v31 = vadd.f32 %v1772_v57, %v791_v27  ;;  %v1143_v34 = vpop.f32.mrb[9].mxu0  ;;  %v1191_v35 = vpop.f32.mrb[9].mxu1 }
 0x161   : > { %877 = vst [vmem:[%s1784_s21 + $0x10] sm:$0xff] %v845_v28  ;;  %893 = vst [vmem:[%s1784_s21 + $0x90] sm:$0xff] %v861_v29  ;;  %v846_v36 = vmax.f32 %v814_v30, 0.0  ;;  %v1144_v38 = vadd.f32 %v1143_v34, %v1142_v32  ;;  %v1192_v39 = vadd.f32 %v1191_v35, %v1190_v33  ;;  %v1145_v40 = vpop.f32.mrb[10].mxu0  ;;  %v1193_v41 = vpop.f32.mrb[10].mxu1 }
 0x162   : > { %v862_v37 = vmax.f32 %v830_v31, 0.0  ;;  %v1146_v42 = vpop.f32.mrb[11].mxu0  ;;  %v1194_v43 = vpop.f32.mrb[11].mxu1 }
 0x163   : > { %878 = vst [vmem:[%s1784_s21 + $0x18] sm:$0xff] %v846_v36  ;;  %v776_v44 = vmul.f32 %v1144_v38, %v1767_v51  ;;  %v792_v45 = vmul.f32 %v1192_v39, %v1767_v51  ;;  %v1147_v46 = vadd.f32 %v1146_v42, %v1145_v40  ;;  %v1195_v47 = vadd.f32 %v1194_v43, %v1193_v41 }
 0x164   : > { %894 = vst [vmem:[%s1784_s21 + $0x98] sm:$0xff] %v862_v37 }
 0x165   : > { %v815_v48 = vadd.f32 %v1772_v57, %v776_v44  ;;  %v831_v49 = vadd.f32 %v1772_v57, %v792_v45  ;;  %v777_v50 = vmul.f32 %v1147_v46, %v1767_v51  ;;  %v793_v52 = vmul.f32 %v1195_v47, %v1767_v51 }
 0x167   : > { %v847_v53 = vmax.f32 %v815_v48, 0.0  ;;  %v863_v54 = vmax.f32 %v831_v49, 0.0  ;;  %v816_v55 = vadd.f32 %v1772_v57, %v777_v50  ;;  %v832_v56 = vadd.f32 %v1772_v57, %v793_v52  ;;  %v1148_v58 = vpop.f32.mrb[12].mxu0  ;;  %v1196_v59 = vpop.f32.mrb[12].mxu1 }
 0x168   : > { %v1149_v60 = vpop.f32.mrb[13].mxu0  ;;  %v1197_v61 = vpop.f32.mrb[13].mxu1 }
 0x169   : > { %879 = vst [vmem:[%s1784_s21 + $0x20] sm:$0xff] %v847_v53  ;;  %895 = vst [vmem:[%s1784_s21 + $0xa0] sm:$0xff] %v863_v54  ;;  %v848_v62 = vmax.f32 %v816_v55, 0.0  ;;  %v864_v63 = vmax.f32 %v832_v56, 0.0  ;;  %v1150_v0 = vadd.f32 %v1149_v60, %v1148_v58  ;;  %v1198_v1 = vadd.f32 %v1197_v61, %v1196_v59  ;;  %v1151_v2 = vpop.f32.mrb[14].mxu0  ;;  %v1199_v3 = vpop.f32.mrb[14].mxu1 }
 0x16a   : > { %v1152_v4 = vpop.f32.mrb[15].mxu0  ;;  %v1200_v5 = vpop.f32.mrb[15].mxu1 }
 0x16b   : > { %880 = vst [vmem:[%s1784_s21 + $0x28] sm:$0xff] %v848_v62  ;;  %896 = vst [vmem:[%s1784_s21 + $0xa8] sm:$0xff] %v864_v63  ;;  %v778_v6 = vmul.f32 %v1150_v0, %v1767_v51  ;;  %v794_v7 = vmul.f32 %v1198_v1, %v1767_v51  ;;  %v1153_v8 = vadd.f32 %v1152_v4, %v1151_v2 }
 0x16c   : > { %v1201_v9 = vadd.f32 %v1200_v5, %v1199_v3 }
 0x16d   : > { %v817_v10 = vadd.f32 %v1772_v57, %v778_v6  ;;  %v833_v11 = vadd.f32 %v1772_v57, %v794_v7  ;;  %v779_v12 = vmul.f32 %v1153_v8, %v1767_v51 }
 0x16e   : > { %v795_v13 = vmul.f32 %v1201_v9, %v1767_v51 }
 0x16f   : > { %v849_v14 = vmax.f32 %v817_v10, 0.0  ;;  %v865_v15 = vmax.f32 %v833_v11, 0.0  ;;  %v818_v16 = vadd.f32 %v1772_v57, %v779_v12  ;;  %v1154_v18 = vpop.f32.mrb[16].mxu0  ;;  %v1202_v19 = vpop.f32.mrb[16].mxu1 }
 0x170   : > { %v834_v17 = vadd.f32 %v1772_v57, %v795_v13  ;;  %v1155_v20 = vpop.f32.mrb[17].mxu0  ;;  %v1203_v21 = vpop.f32.mrb[17].mxu1 }
 0x171   : > { %881 = vst [vmem:[%s1784_s21 + $0x30] sm:$0xff] %v849_v14  ;;  %897 = vst [vmem:[%s1784_s21 + $0xb0] sm:$0xff] %v865_v15  ;;  %v850_v22 = vmax.f32 %v818_v16, 0.0  ;;  %v1156_v24 = vadd.f32 %v1155_v20, %v1154_v18  ;;  %v1204_v25 = vadd.f32 %v1203_v21, %v1202_v19  ;;  %v1157_v26 = vpop.f32.mrb[18].mxu0  ;;  %v1205_v27 = vpop.f32.mrb[18].mxu1 }
 0x172   : > { %v866_v23 = vmax.f32 %v834_v17, 0.0  ;;  %v1158_v28 = vpop.f32.mrb[19].mxu0  ;;  %v1206_v29 = vpop.f32.mrb[19].mxu1 }
 0x173   : > { %882 = vst [vmem:[%s1784_s21 + $0x38] sm:$0xff] %v850_v22  ;;  %v780_v30 = vmul.f32 %v1156_v24, %v1767_v51  ;;  %v796_v31 = vmul.f32 %v1204_v25, %v1767_v51  ;;  %v1159_v32 = vadd.f32 %v1158_v28, %v1157_v26  ;;  %v1207_v33 = vadd.f32 %v1206_v29, %v1205_v27 }
 0x174   : > { %898 = vst [vmem:[%s1784_s21 + $0xb8] sm:$0xff] %v866_v23 }
 0x175   : > { %v819_v34 = vadd.f32 %v1772_v57, %v780_v30  ;;  %v835_v35 = vadd.f32 %v1772_v57, %v796_v31  ;;  %v781_v36 = vmul.f32 %v1159_v32, %v1767_v51  ;;  %v797_v37 = vmul.f32 %v1207_v33, %v1767_v51 }
 0x177   : > { %v851_v38 = vmax.f32 %v819_v34, 0.0  ;;  %v867_v39 = vmax.f32 %v835_v35, 0.0  ;;  %v820_v40 = vadd.f32 %v1772_v57, %v781_v36  ;;  %v836_v41 = vadd.f32 %v1772_v57, %v797_v37  ;;  %v1160_v42 = vpop.f32.mrb[20].mxu0  ;;  %v1208_v43 = vpop.f32.mrb[20].mxu1 }
 0x178   : > { %v1161_v44 = vpop.f32.mrb[21].mxu0  ;;  %v1209_v45 = vpop.f32.mrb[21].mxu1 }
 0x179   : > { %883 = vst [vmem:[%s1784_s21 + $0x40] sm:$0xff] %v851_v38  ;;  %899 = vst [vmem:[%s1784_s21 + $0xc0] sm:$0xff] %v867_v39  ;;  %v852_v46 = vmax.f32 %v820_v40, 0.0  ;;  %v868_v47 = vmax.f32 %v836_v41, 0.0  ;;  %v1162_v48 = vadd.f32 %v1161_v44, %v1160_v42  ;;  %v1210_v49 = vadd.f32 %v1209_v45, %v1208_v43  ;;  %v1163_v50 = vpop.f32.mrb[22].mxu0  ;;  %v1211_v52 = vpop.f32.mrb[22].mxu1 }
 0x17a   : > { %v1164_v53 = vpop.f32.mrb[23].mxu0  ;;  %v1212_v54 = vpop.f32.mrb[23].mxu1 }
 0x17b   : > { %884 = vst [vmem:[%s1784_s21 + $0x48] sm:$0xff] %v852_v46  ;;  %900 = vst [vmem:[%s1784_s21 + $0xc8] sm:$0xff] %v868_v47  ;;  %v782_v55 = vmul.f32 %v1162_v48, %v1767_v51  ;;  %v798_v56 = vmul.f32 %v1210_v49, %v1767_v51  ;;  %v1165_v58 = vadd.f32 %v1164_v53, %v1163_v50 }
 0x17c   : > { %v1213_v59 = vadd.f32 %v1212_v54, %v1211_v52 }
 0x17d   : > { %v821_v60 = vadd.f32 %v1772_v57, %v782_v55  ;;  %v837_v61 = vadd.f32 %v1772_v57, %v798_v56  ;;  %v783_v62 = vmul.f32 %v1165_v58, %v1767_v51 }
 0x17e   : > { %v799_v63 = vmul.f32 %v1213_v59, %v1767_v51 }
 0x17f   : > { %v853_v0 = vmax.f32 %v821_v60, 0.0  ;;  %v869_v1 = vmax.f32 %v837_v61, 0.0  ;;  %v822_v2 = vadd.f32 %v1772_v57, %v783_v62  ;;  %v1166_v4 = vpop.f32.mrb[24].mxu0  ;;  %v1214_v5 = vpop.f32.mrb[24].mxu1 }
 0x180   : > { %v838_v3 = vadd.f32 %v1772_v57, %v799_v63  ;;  %v1167_v6 = vpop.f32.mrb[25].mxu0  ;;  %v1215_v7 = vpop.f32.mrb[25].mxu1 }
 0x181   : > { %885 = vst [vmem:[%s1784_s21 + $0x50] sm:$0xff] %v853_v0  ;;  %901 = vst [vmem:[%s1784_s21 + $0xd0] sm:$0xff] %v869_v1  ;;  %v854_v8 = vmax.f32 %v822_v2, 0.0  ;;  %v1168_v10 = vadd.f32 %v1167_v6, %v1166_v4  ;;  %v1216_v11 = vadd.f32 %v1215_v7, %v1214_v5  ;;  %v1169_v12 = vpop.f32.mrb[26].mxu0  ;;  %v1217_v13 = vpop.f32.mrb[26].mxu1 }
 0x182   : > { %v870_v9 = vmax.f32 %v838_v3, 0.0  ;;  %v1170_v14 = vpop.f32.mrb[27].mxu0  ;;  %v1218_v15 = vpop.f32.mrb[27].mxu1 }
 0x183   : > { %886 = vst [vmem:[%s1784_s21 + $0x58] sm:$0xff] %v854_v8  ;;  %v784_v16 = vmul.f32 %v1168_v10, %v1767_v51  ;;  %v800_v17 = vmul.f32 %v1216_v11, %v1767_v51  ;;  %v1171_v18 = vadd.f32 %v1170_v14, %v1169_v12  ;;  %v1219_v19 = vadd.f32 %v1218_v15, %v1217_v13 }
 0x184   : > { %902 = vst [vmem:[%s1784_s21 + $0xd8] sm:$0xff] %v870_v9 }
 0x185   : > { %v823_v20 = vadd.f32 %v1772_v57, %v784_v16  ;;  %v839_v21 = vadd.f32 %v1772_v57, %v800_v17  ;;  %v785_v22 = vmul.f32 %v1171_v18, %v1767_v51  ;;  %v801_v23 = vmul.f32 %v1219_v19, %v1767_v51 }
 0x187   : > { %v855_v24 = vmax.f32 %v823_v20, 0.0  ;;  %v871_v25 = vmax.f32 %v839_v21, 0.0  ;;  %v824_v26 = vadd.f32 %v1772_v57, %v785_v22  ;;  %v840_v27 = vadd.f32 %v1772_v57, %v801_v23  ;;  %v1172_v28 = vpop.f32.mrb[28].mxu0  ;;  %v1220_v29 = vpop.f32.mrb[28].mxu1 }
 0x188   : > { %v1173_v30 = vpop.f32.mrb[29].mxu0  ;;  %v1221_v31 = vpop.f32.mrb[29].mxu1 }
 0x189   : > { %887 = vst [vmem:[%s1784_s21 + $0x60] sm:$0xff] %v855_v24  ;;  %903 = vst [vmem:[%s1784_s21 + $0xe0] sm:$0xff] %v871_v25  ;;  %v856_v32 = vmax.f32 %v824_v26, 0.0  ;;  %v872_v33 = vmax.f32 %v840_v27, 0.0  ;;  %v1174_v34 = vadd.f32 %v1173_v30, %v1172_v28  ;;  %v1222_v35 = vadd.f32 %v1221_v31, %v1220_v29  ;;  %v1175_v36 = vpop.f32.mrb[30].mxu0  ;;  %v1223_v37 = vpop.f32.mrb[30].mxu1 }
 0x18a   : > { %v1176_v38 = vpop.f32.mrb[31].mxu0  ;;  %v1224_v39 = vpop.f32.mrb[31].mxu1 }
 0x18b   : > { %888 = vst [vmem:[%s1784_s21 + $0x68] sm:$0xff] %v856_v32  ;;  %904 = vst [vmem:[%s1784_s21 + $0xe8] sm:$0xff] %v872_v33  ;;  %v786_v40 = vmul.f32 %v1174_v34, %v1767_v51  ;;  %v802_v41 = vmul.f32 %v1222_v35, %v1767_v51  ;;  %v1177_v42 = vadd.f32 %v1176_v38, %v1175_v36 }
 0x18c   : > { %v1225_v43 = vadd.f32 %v1224_v39, %v1223_v37 }
 0x18d   : > { %v825_v44 = vadd.f32 %v1772_v57, %v786_v40  ;;  %v841_v45 = vadd.f32 %v1772_v57, %v802_v41  ;;  %v787_v46 = vmul.f32 %v1177_v42, %v1767_v51 }
 0x18e   : > { %v803_v47 = vmul.f32 %v1225_v43, %v1767_v51 }
 0x18f   : > { %v857_v48 = vmax.f32 %v825_v44, 0.0  ;;  %v873_v49 = vmax.f32 %v841_v45, 0.0  ;;  %v826_v50 = vadd.f32 %v1772_v57, %v787_v46 }
 0x190   : > { %v842_v52 = vadd.f32 %v1772_v57, %v803_v47 }
 0x191   : > { %889 = vst [vmem:[%s1784_s21 + $0x70] sm:$0xff] %v857_v48  ;;  %905 = vst [vmem:[%s1784_s21 + $0xf0] sm:$0xff] %v873_v49  ;;  %v858_v51 = vmax.f32 %v826_v50, 0.0 }
 0x192   : > { %v874_v53 = vmax.f32 %v842_v52, 0.0 }
 0x193   : > { %890 = vst [vmem:[%s1784_s21 + $0x78] sm:$0xff] %v858_v51 }
 0x194   : > { %906 = vst [vmem:[%s1784_s21 + $0xf8] sm:$0xff] %v874_v53 }
 0x195   : > { %1456 = shalt.err (!%p1453_p5)
}
 0x196   : > { %s1457_s29 = scalar_lea.hbm %s1875_s30, 4096  ;;  %s1461_s27 = scalar_lea.hbm %s1933_s4, 32768 }
 0x197   : > { %p1458_p9 = scmp.ne.s32.totalorder %s1875_s30, %s1457_s29  ;;  %p1462_p3 = scmp.lt.u32.totalorder %s1875_s30, %s1933_s4 }
 0x198   : > { %p1463_p7 = scmp.lt.u32.totalorder %s1461_s27, %s1457_s29  ;;  %p1465_p4 = scmp.lt.u32.totalorder %s1457_s29, %s1875_s30 }
 0x199   : > { %p1459_p1 = pnand %p1458_p9, %p1660_p11 }
 0x19a   : > { %p1464_p13 = por %p1463_p7, %p1462_p3 }
 0x19b   : > { %p1460_p2 = pneg %p1459_p1 }
 0x19c   : > { %p1466_p6 = por %p1465_p4, %p1464_p13 }
 0x19e   : > { %p1467_p8 = pnand %p1466_p6, %p1460_p2 }
 0x1a0   : > { %1470 = shalt.err (!%p1467_p8)
}
 0x1a1   : > { %s1538_s22 = smov 128   ;;  %s1539_s13 = smov 8  }
 0x1a2   : > { %1248 = dma.vmem_to_hbm [thread:$0]  (%p1660_p11), %s1877_s28, 4096, %s1875_s30, %s908_s18, %s1538_s22, %s1538_s22, %s1539_s13  }
 0x1a3 PF: > { %p1265_p12 = scmp.ge.s32.totalorder %s1529_s20, 2  ;;  %s937_s24 = sand.u32 1, %s1509_s15  }
 0x1a4   : > { %p1951_p10 = scmp.ne.s32.totalorder %s1941_s26, 0  ;;  %s938_s6 = scalar_lea.sflag [#allocation4], %s937_s24 }
 0x1a6   : > { %p1259_p0 = pnand %p1265_p12, %p1951_p10 }
 0x1a8   : > { %1504 = dma.done.wait (!%p1259_p0), %s938_s6, 4096  }
 0x1a9   : > { %1506 = vsyncadd (!%p1259_p0), %s938_s6, 4294963200  ;;  %s21_s20 = sadd.s32 1, %s1529_s20   ;;  %s1952_s15 = smov %s1513_s16 }
 0x1aa   : > { %p18_p5 = scmp.ge.s32.totalorder %s21_s20, 10   ;;  %s1953_s16 = smov %s1517_s17 }
 0x1ab   : > { %s1954_s17 = smov %s1669_s10  ;;  %s1955_s18 = smov %s1525_s19 }
 0x1ac   : > { %s1956_s19 = smov %s1958_s5  ;;  %20 = sbr.rel (!%p18_p5) target bundleno = 7 (0x7), region = 92 }
 0x1b3   :  { %943 = vsyncpa [#allocation3], 1 }
 0x1b4   :  { %945 = vsyncpa [#allocation3 + $0x1], 1 }
 0x1b5   :  { %946 = vsyncpa [#allocation6], 1 }
 0x1b6   :  { %947 = vsyncpa [#allocation4], 1 }
 0x1b7   :  { %949 = vsyncpa [#allocation4 + $0x1], 1 }

</bundles_post_ra>
